<compile_context>
chip_gen: v7x
topology: tpu7x:2x2x1
jax: 0.10.0
libtpu: 0.0.40
codegen_flags: <defaults>
</compile_context>

<pallas_src>
import functools

import jax
import jax.numpy as jnp
from jax.experimental import pallas as pl
from jax.experimental.pallas import tpu as pltpu


def _ce_partial_kernel(x_ref, lab_ref, part_ref, *, n_total, tile_rows):
    # x_ref:    (TN, C) logits in their native dtype (bf16/f32), one row tile
    # lab_ref:  (TN, 1) int32 class indices for this tile
    # part_ref: (8, 128) f32 output block; the tile's partial sum broadcast
    i = pl.program_id(0)

    x = x_ref[...].astype(jnp.float32)          # in-kernel upcast (bf16 ok)
    lab = lab_ref[...]                          # (TN, 1) int32
    tn, c = x.shape

    # Numerically stable pieces; the row max cancels out of the final loss.
    m = jnp.max(x, axis=-1, keepdims=True)                       # (TN, 1)
    xm = x - m                                                   # (TN, C)
    sum_exp = jnp.sum(jnp.exp(xm), axis=-1, keepdims=True)       # (TN, 1)

    # Select the target (shifted) logit via iota compare — no one-hot
    # cast/multiply, reuses the xm temporary.
    cls_idx = jax.lax.broadcasted_iota(jnp.int32, (tn, c), 1)
    picked_m = jnp.sum(jnp.where(cls_idx == lab, xm, 0.0),
                       axis=-1, keepdims=True)                   # (TN, 1)

    # per-sample CE:  logsumexp(x) - x[label]  ==  log(sum exp(xm)) - xm[label]
    per_sample = jnp.log(sum_exp) - picked_m                     # (TN, 1)

    # Mask rows that fall past the true N (garbage in the padded last tile).
    row_idx = jax.lax.broadcasted_iota(jnp.int32, (tn, 1), 0)
    valid = row_idx < (n_total - i * tile_rows)
    partial = jnp.sum(jnp.where(valid, per_sample, 0.0))

    # Lane-dense (8, 128) store of the scalar partial (layout-legal block).
    part_ref[...] = jnp.full((8, 128), partial, dtype=jnp.float32)


def _choose_tile_rows(n, c, itemsize, vmem_budget_bytes=8 * 1024 * 1024):
    """Pick a row-tile size: big enough to stream near HBM roofline, small
    enough that the double-buffered logit tile fits every generation's default
    scoped VMEM (v5e 16 MiB ... v7x 32 MiB)."""
    max_rows = vmem_budget_bytes // max(1, 2 * c * itemsize)   # 2x = double buffer
    tn = max(8, min(2048, (max_rows // 8) * 8))
    n_pad = ((n + 7) // 8) * 8
    return min(tn, n_pad)


def cross_entropy_counter_loss(cls_score, label, loss_weight=1.0, tile_rows=None):
    """JAX wrapper reproducing CrossEntropyCounterLoss.forward (default config).

    Args:
      cls_score: (N, C) float logits (bf16 or f32 — streamed in native dtype).
      label:     (N,)   integer class indices in [0, C).
      loss_weight: scalar multiplier.
      tile_rows: optional row-tile override (must be a multiple of 8).
    Returns:
      scalar float32 loss.
    """
    n, c = cls_score.shape
    label2d = label.reshape(n, 1).astype(jnp.int32)

    if tile_rows is None:
        tile_rows = _choose_tile_rows(n, c, cls_score.dtype.itemsize)
    assert tile_rows % 8 == 0, "tile_rows must be a multiple of 8"
    num_tiles = -(-n // tile_rows)   # static ceil-div

    kernel = functools.partial(
        _ce_partial_kernel, n_total=n, tile_rows=tile_rows)

    partials = pl.pallas_call(
        kernel,
        out_shape=jax.ShapeDtypeStruct((num_tiles * 8, 128), jnp.float32),
        grid_spec=pltpu.PrefetchScalarGridSpec(
            num_scalar_prefetch=0,
            grid=(num_tiles,),
            in_specs=[
                pl.BlockSpec((tile_rows, c), lambda i: (i, 0)),  # logit row tile
                pl.BlockSpec((tile_rows, 1), lambda i: (i, 0)),  # label row tile
            ],
            out_specs=pl.BlockSpec((8, 128), lambda i: (i, 0)),  # per-tile partial
        ),
        compiler_params=pltpu.CompilerParams(
            dimension_semantics=("parallel",)),
    )(cls_score, label2d)

    # Cross-tile reduction + mean + loss_weight (tiny, done in the wrapper).
    total = jnp.sum(partials[::8, 0])
    return total * (jnp.float32(loss_weight) / jnp.float32(n))


def _reference_loss(cls_score, label, loss_weight=1.0):
    logp = jax.nn.log_softmax(cls_score.astype(jnp.float32), axis=-1)
    nll = -jnp.take_along_axis(logp, label.reshape(-1, 1), axis=-1)[:, 0]
    return loss_weight * jnp.mean(nll)


if __name__ == "__main__":
    key = jax.random.PRNGKey(0)
    k1, k2, k3, k4 = jax.random.split(key, 4)

    # --- case 1: small f32, single tile ---------------------------------
    N, C = 16, 128
    cls_score = jax.random.normal(k1, (N, C), dtype=jnp.float32)
    label = jax.random.randint(k2, (N,), 0, C, dtype=jnp.int32)

    loss = cross_entropy_counter_loss(cls_score, label, loss_weight=1.0)
    loss = jax.block_until_ready(loss)
    ref = _reference_loss(cls_score, label, loss_weight=1.0)
    assert jnp.allclose(loss, ref, atol=1e-5, rtol=1e-5), (loss, ref)

    # --- case 2: bf16 logits (native-dtype streaming, in-kernel upcast),
    #             ragged N with a forced small tile -> multi-tile grid with a
    #             masked, partially-padded last tile ------------------------
    N2, C2 = 20, 96
    cls_bf16 = jax.random.normal(k3, (N2, C2), dtype=jnp.float32).astype(jnp.bfloat16)
    label2 = jax.random.randint(k4, (N2,), 0, C2, dtype=jnp.int32)

    loss2 = cross_entropy_counter_loss(cls_bf16, label2, loss_weight=0.5,
                                       tile_rows=8)   # grid = 3 tiles
    loss2 = jax.block_until_ready(loss2)
    ref2 = _reference_loss(cls_bf16, label2, loss_weight=0.5)
    assert jnp.allclose(loss2, ref2, atol=1e-4, rtol=1e-4), (loss2, ref2)

    print("KERNEL_OK")
</pallas_src>

<mosaic_0001>
module attributes {stable_mosaic.version = 11 : i64} {
  func.func @_ce_partial_kernel(%arg0: i32, %arg1: memref<16x128xf32, #tpu.memory_space<vmem>>, %arg2: memref<16x1xi32, #tpu.memory_space<vmem>>, %arg3: memref<8x128xf32, #tpu.memory_space<vmem>>) attributes {dimension_semantics = [#tpu.dimension_semantics<parallel>], iteration_bounds = array<i64: 1>, scalar_prefetch = 0 : i64, scratch_operands = 0 : i64, tpu.core_type = #tpu.core_type<tc>, window_params = [{transform_indices = @transform_0, window_bounds = array<i64: 16, 128>}, {transform_indices = @transform_1, window_bounds = array<i64: 16, 1>}, {transform_indices = @transform_2, window_bounds = array<i64: 8, 128>}]} {
    %c0 = arith.constant 0 : index
    %c0_0 = arith.constant 0 : index
    %0 = vector.load %arg1[%c0, %c0_0] : memref<16x128xf32, #tpu.memory_space<vmem>>, vector<16x128xf32>
    %c0_1 = arith.constant 0 : index
    %c0_2 = arith.constant 0 : index
    %1 = vector.load %arg2[%c0_1, %c0_2] : memref<16x1xi32, #tpu.memory_space<vmem>>, vector<16x1xi32>
    %cst = arith.constant dense<0xFF800000> : vector<16xf32>
    %2 = vector.multi_reduction <maximumf>, %0, %cst [1] : vector<16x128xf32> to vector<16xf32>
    %3 = vector.shape_cast %2 : vector<16xf32> to vector<16x1xf32>
    %4 = vector.broadcast %3 : vector<16x1xf32> to vector<16x128xf32>
    %5 = arith.subf %0, %4 : vector<16x128xf32>
    %6 = math.exp %5 : vector<16x128xf32>
    %cst_3 = arith.constant dense<0.000000e+00> : vector<16xf32>
    %7 = vector.multi_reduction <add>, %6, %cst_3 [1] : vector<16x128xf32> to vector<16xf32>
    %8 = vector.shape_cast %7 : vector<16xf32> to vector<16x1xf32>
    %9 = tpu.iota {dimensions = array<i32: 1>} : vector<16x128xi32>
    %10 = vector.broadcast %1 : vector<16x1xi32> to vector<16x128xi32>
    %11 = arith.cmpi eq, %9, %10 : vector<16x128xi32>
    %cst_4 = arith.constant 0.000000e+00 : f32
    %12 = vector.broadcast %cst_4 : f32 to vector<16x128xf32>
    %13 = arith.select %11, %5, %12 : vector<16x128xi1>, vector<16x128xf32>
    %cst_5 = arith.constant dense<0.000000e+00> : vector<16xf32>
    %14 = vector.multi_reduction <add>, %13, %cst_5 [1] : vector<16x128xf32> to vector<16xf32>
    %15 = vector.shape_cast %14 : vector<16xf32> to vector<16x1xf32>
    %16 = math.log %8 : vector<16x1xf32>
    %17 = arith.subf %16, %15 : vector<16x1xf32>
    %18 = tpu.iota {dimensions = array<i32: 0>} : vector<16x1xi32>
    %c16_i32 = arith.constant 16 : i32
    %19 = arith.muli %arg0, %c16_i32 : i32
    %c16_i32_6 = arith.constant 16 : i32
    %20 = arith.subi %c16_i32_6, %19 : i32
    %21 = vector.broadcast %20 : i32 to vector<16x1xi32>
    %22 = arith.cmpi slt, %18, %21 : vector<16x1xi32>
    %cst_7 = arith.constant 0.000000e+00 : f32
    %23 = vector.broadcast %cst_7 : f32 to vector<16x1xf32>
    %24 = arith.select %22, %17, %23 : vector<16x1xi1>, vector<16x1xf32>
    %25 = vector.shape_cast %24 : vector<16x1xf32> to vector<1x16x1xf32>
    %cst_8 = arith.constant dense<0.000000e+00> : vector<1xf32>
    %26 = vector.multi_reduction <add>, %25, %cst_8 [1, 2] : vector<1x16x1xf32> to vector<1xf32>
    %27 = vector.shape_cast %26 : vector<1xf32> to vector<1x1x1xf32>
    %28 = vector.extract %27[0, 0, 0] : f32 from vector<1x1x1xf32>
    %29 = vector.broadcast %28 : f32 to vector<8x128xf32>
    %c0_9 = arith.constant 0 : index
    %c0_10 = arith.constant 0 : index
    %30 = vector.load %arg3[%c0_9, %c0_10] : memref<8x128xf32, #tpu.memory_space<vmem>>, vector<8x128xf32>
    tpu.vector_store %arg3[%c0_9, %c0_10], %29 {strides = array<i32>} : memref<8x128xf32, #tpu.memory_space<vmem>>, vector<8x128xf32>,
    return
  }
  func.func @transform_0(%arg0: i32) -> (i32, i32) {
    %c0_i32 = arith.constant 0 : i32
    %c0_i32_0 = arith.constant 0 : i32
    return %arg0, %c0_i32 : i32, i32
  }
  func.func @transform_1(%arg0: i32) -> (i32, i32) {
    %c0_i32 = arith.constant 0 : i32
    %c0_i32_0 = arith.constant 0 : i32
    return %arg0, %c0_i32 : i32, i32
  }
  func.func @transform_2(%arg0: i32) -> (i32, i32) {
    %c0_i32 = arith.constant 0 : i32
    %c0_i32_0 = arith.constant 0 : i32
    return %arg0, %c0_i32 : i32, i32
  }
}

</mosaic_0001>

<bundles_post_ra>
// kernel: tpu_custom_call.1
= control target key start
LH: loop header
LB: loop body
LE: loop exit
PB: predicated region body
PF: predicated region fallthrough
CT: control target
= control target key end

     0   :  { %v129_v2 = vmov 0   ;;  %s170_s0 = inlined_call_operand.vmem [shape: f32[16,128], index: 0, kind: input, shape index: {}]   ;;  %s171_s1 = inlined_call_operand.vmem [shape: s32[16,1], index: 1, kind: input, shape index: {}]   ;;  %s172_s2 = inlined_call_operand.hbm [shape: f32[8,128], index: 2, kind: output, shape index: {}]  }
   0x1   :  { %v12_v0 = vld [vmem:[%s170_s0] sm:$0xff]  ;;  %95 = vset.pattern.permute.xlu1 %v129_v2 }
   0x2   :  { %v14_v1 = vld [vmem:[%s171_s1] sm:$0xff]  ;;  %16 = vmax.xlane.f32.xlu0 %v12_v0 }
   0x3   :  { %7 = vsyncpa [#allocation3], 0  ;;  %v13_v3 = vld [vmem:[%s170_s0 + $0x8] sm:$0xff]  ;;  %33 = vperm.xlu1 %95, %v14_v1   ;;  %96 = vset.pattern.permute.xlu0 %v129_v2  ;;  %v30_v11 = vlaneseq  ;;  %vm62_vm2 = vcmask 7168   ;;  %s130_s0 = smov [#allocation2]  }
   0x4   :  { %v15_v4 = vld [vmem:[%s171_s1 + $0x8] sm:$0xff]  ;;  %s83_s1 = sshll.u32 %s130_s0, 4  ;;  %s84_s1 = int_to_ptr.vmem [resolvable:$true] %s83_s1 }
   0x5   :  { %v31_v13 = vand.u32 127, %v30_v11  ;;  %s105_s18 = scalar_lea.vmem %s84_s1, 128  ;;  %p110_p1 = scmp.lt.s32.totalorder %s84_s1, %s84_s1 }
   0x6   :  { %18 = vmax.xlane.f32.xlu0 %v13_v3  ;;  %p106_p0 = scmp.ne.s32.totalorder %s84_s1, %s105_s18  ;;  %p111_p2 = scmp.lt.s32.totalorder %s105_s18, %s105_s18 }
   0x7   :  { %36 = vperm.xlu1 %95, %v15_v4  }
   0x8   :  { %p112_p3 = por %p111_p2, %p110_p1 }
   0xa   :  { %p113_p4 = pnand %p112_p3, %p106_p0 }
  0x82   :  { %v34_v12 = vpop.permute.xlu1 %33 }
  0x83   :  { %vm38_vm0 = vcmp.eq.s32.totalorder %v31_v13, %v34_v12 }
  0x86   :  { %v37_v15 = vpop.permute.xlu1 %36 }
  0x87   :  { %vm39_vm1 = vcmp.eq.s32.totalorder %v31_v13, %v37_v15 }
  0x8f   :  { %v17_v5 = vpop.xlane.xlu0 %16 }
  0x90   :  { %v20_v6 = vsub.f32 %v12_v0, %v17_v5 }
  0x92   :  { %v22_v7 = vmul.f32 1.442695, %v20_v6  ;;  %v40_v17 = vsel %vm38_vm0, %v20_v6, 0.0 }
  0x93   :  { %v19_v8 = vpop.xlane.xlu0 %18 }
  0x94   :  { %97 = vpow2.f32 %v22_v7  ;;  %v21_v9 = vsub.f32 %v13_v3, %v19_v8 }
  0x96   :  { %v24_v10 = vmul.f32 1.442695, %v21_v9  ;;  %v41_v18 = vsel %vm39_vm1, %v21_v9, 0.0 }
  0x98   :  { %99 = vpow2.f32 %v24_v10 }
  0x9e   :  { %v98_v14 = vpop.eup %97 }
  0x9f   :  { %26 = vadd.xlane.f32.xlu0 %v98_v14 }
  0xa2   :  { %v100_v16 = vpop.eup %99 }
  0xa3   :  { %42 = vadd.xlane.f32.xlu0 %v40_v17  ;;  %28 = vadd.xlane.f32.xlu1 %v100_v16 }
  0xa7   :  { %44 = vadd.xlane.f32.xlu0 %v41_v18 }
 0x12c   :  { %v27_v19 = vpop.xlane.xlu0 %26 }
 0x12d   :  { %101 = vlog2.f32 %v27_v19 }
 0x130   :  { %v29_v20 = vpop.xlane.xlu1 %28  ;;  %v43_v22 = vpop.xlane.xlu0 %42 }
 0x131   :  { %103 = vlog2.f32 %v29_v20 }
 0x134   :  { %v45_v27 = vpop.xlane.xlu0 %44 }
 0x137   :  { %v102_v21 = vpop.eup %101 }
 0x138   :  { %v47_v23 = vmul.f32 0.6931472, %v102_v21 }
 0x13a   :  { %v50_v25 = vsub.f32 %v47_v23, %v43_v22 }
 0x13b   :  { %v104_v24 = vpop.eup %103 }
 0x13c   :  { %v49_v26 = vmul.f32 0.6931472, %v104_v24  ;;  %v63_v29 = vsel %vm62_vm2, %v50_v25, 0.0 }
 0x13e   :  { %v51_v28 = vsub.f32 %v49_v26, %v45_v27 }
 0x140   :  { %v64_v30 = vsel %vm62_vm2, %v51_v28, 0.0 }
 0x141   :  { %v65_v31 = vadd.f32 %v64_v30, %v63_v29 }
 0x143   :  { %66 = vadd.xlane.f32.xlu0 %v65_v31 }
 0x1d0   :  { %v67_v32 = vpop.xlane.xlu0 %66 }
 0x1d1   :  { %v68_v33 = vrot.slane %v67_v32, 4 }
 0x1d3   :  { %v69_v34 = vadd.f32 %v68_v33, %v67_v32 }
 0x1d5   :  { %v70_v35 = vrot.slane %v69_v34, 2 }
 0x1d7   :  { %v71_v36 = vadd.f32 %v70_v35, %v69_v34 }
 0x1d9   :  { %v72_v37 = vrot.slane %v71_v36, 1 }
 0x1db   :  { %v73_v38 = vadd.f32 %v72_v37, %v71_v36 }
 0x1dd   :  { %91 = vpush %v73_v38 }
 0x20e   :  { %s92_s17 = spop %91 }
 0x20f   :  { %v75_v39 = vstv %s92_s17 }
 0x210   :  { %76 = vst [vmem:[#allocation2] sm:$0xff] %v75_v39 }
 0x211   :  { %116 = shalt.err (!%p113_p4)
}
 0x212   :  { %s117_s21 = scalar_lea.hbm %s172_s2, 128 }
 0x213   :  { %p118_p5 = scmp.ne.s32.totalorder %s172_s2, %s117_s21  ;;  %p121_p6 = scmp.lt.u32.totalorder %s117_s21, %s172_s2 }
 0x215   :  { %p123_p7 = pnand %p121_p6, %p118_p5 }
 0x217   :  { %126 = shalt.err (!%p123_p7)
}
 0x218   :  { %86 = dma.vmem_to_hbm [thread:$0]  %s84_s1, 128, %s172_s2, [#allocation3]  }
 0x219   :  { %127 = dma.done.wait [#allocation3], 128  }
 0x21a   :  { %128 = vsyncadd [#allocation3], 4294967168 }
 0x21b   :  { %90 = vsyncpa [#allocation3], 1 }

</bundles_post_ra>
